<compile_context>
chip_gen: v5e
topology: v5e:2x2
jax: 0.10.0
libtpu: 0.0.40
codegen_flags: <defaults>
</compile_context>

<pallas_src>
import functools

import jax
import jax.numpy as jnp
from jax import lax
from jax.experimental import pallas as pl
from jax.experimental.pallas import tpu as pltpu


def _self_output_kernel(x_ref, res_ref, w_ref, p_ref, o_ref, acc_ref, *, eps: float):
    k = pl.program_id(1)

    @pl.when(k == 0)
    def _init():
        acc_ref[...] = jnp.zeros_like(acc_ref)

    # Partial matmul on the MXU: contract x[:, K-tile] with W[:, K-tile] over
    # the weight's *last* (H_in) axis. Operands in native dtype, f32 accumulate.
    acc_ref[...] += lax.dot_general(
        x_ref[...], w_ref[...],
        dimension_numbers=(((1,), (1,)), ((), ())),
        preferred_element_type=jnp.float32)

    @pl.when(k == pl.num_programs(1) - 1)
    def _finalize():
        params = p_ref[...].astype(jnp.float32)            # [3, H] = bias/gamma/beta
        bias, gamma, beta = params[0:1, :], params[1:2, :], params[2:3, :]

        # Dropout is identity in eval mode.
        # TODO(synk): training-mode dropout (pltpu.prng_random_bits mask) not wired.
        y = acc_ref[...] + bias + res_ref[...].astype(jnp.float32)

        # LayerNorm over the hidden axis, single reduction pass:
        #   var = E[y^2] - mean^2  (clamped at 0 for safety).
        mean = jnp.mean(y, axis=-1, keepdims=True)
        mean_sq = jnp.mean(y * y, axis=-1, keepdims=True)
        var = jnp.maximum(mean_sq - mean * mean, 0.0)
        norm = (y - mean) * lax.rsqrt(var + eps)
        o_ref[...] = (norm * gamma + beta).astype(o_ref.dtype)


def _round_up(a: int, b: int) -> int:
    return pl.cdiv(a, b) * b


def albert_self_output(hidden_states, input_tensor, weight, bias, gamma, beta,
                       *, eps=1e-12, row_tile=256, k_tile=None):
    """hidden_states, input_tensor: [B, S, H]; weight: [H_out, H_in] (PyTorch
    Linear convention); bias / gamma / beta: [H]."""
    B, S, H = hidden_states.shape
    M = B * S

    # --- row tile: large by default, clamped/padded for awkward M -------------
    tm = min(row_tile, _round_up(M, 8))
    tm = _round_up(tm, 8)
    m_pad = _round_up(M, tm)

    # --- K tile over the contraction (H_in) axis ------------------------------
    if k_tile is None:
        tk = 512 if (H > 1024 and H % 512 == 0) else H
    else:
        tk = k_tile
    assert H % tk == 0, "k_tile must divide the hidden size"
    nk = H // tk

    x2d = hidden_states.reshape(M, H)
    r2d = input_tensor.reshape(M, H)
    if m_pad != M:
        pad = ((0, m_pad - M), (0, 0))
        x2d = jnp.pad(x2d, pad)
        r2d = jnp.pad(r2d, pad)

    # Pack LayerNorm/bias params into one small resident block.
    params = jnp.stack([bias, gamma, beta], axis=0)          # [3, H]

    # --- scoped VMEM budget (double-buffered inputs/outputs + f32 accumulator)
    x_it = x2d.dtype.itemsize
    w_it = weight.dtype.itemsize
    p_it = params.dtype.itemsize
    o_it = hidden_states.dtype.itemsize
    needed = (2 * tm * tk * x_it          # x tiles
              + 2 * tm * H * x_it         # residual tiles
              + 2 * H * tk * w_it         # weight tiles
              + 2 * 3 * H * p_it          # packed params
              + 2 * tm * H * o_it         # output tiles
              + tm * H * 4)               # f32 accumulator scratch
    vmem_limit = int(min(64 * 1024 * 1024, max(32 * 1024 * 1024, 2 * needed)))

    kernel = functools.partial(_self_output_kernel, eps=eps)

    out2d = pl.pallas_call(
        kernel,
        out_shape=jax.ShapeDtypeStruct((m_pad, H), hidden_states.dtype),
        grid_spec=pltpu.PrefetchScalarGridSpec(
            num_scalar_prefetch=0,
            grid=(m_pad // tm, nk),                          # (rows, K)
            in_specs=[
                pl.BlockSpec((tm, tk), lambda i, k: (i, k)),   # x rows / K tile
                pl.BlockSpec((tm, H), lambda i, k: (i, 0)),    # residual rows
                pl.BlockSpec((H, tk), lambda i, k: (0, k)),    # weight [H_out, K tile]
                pl.BlockSpec((3, H), lambda i, k: (0, 0)),     # bias/gamma/beta
            ],
            out_specs=pl.BlockSpec((tm, H), lambda i, k: (i, 0)),
            scratch_shapes=[pltpu.VMEM((tm, H), jnp.float32)],
        ),
        compiler_params=pltpu.CompilerParams(
            dimension_semantics=("parallel", "arbitrary"),
            vmem_limit_bytes=vmem_limit),
    )(x2d, r2d, weight, params)

    if m_pad != M:
        out2d = out2d[:M]
    return out2d.reshape(B, S, H)


def _reference(hidden_states, input_tensor, weight, bias, gamma, beta, eps):
    y = jnp.einsum("bsh,oh->bso", hidden_states, weight) + bias
    y = y + input_tensor
    mean = jnp.mean(y, axis=-1, keepdims=True)
    var = jnp.mean((y - mean) ** 2, axis=-1, keepdims=True)
    return (y - mean) / jnp.sqrt(var + eps) * gamma + beta


if __name__ == "__main__":
    # Small ALBERT-like config: batch=2, seq=8, hidden=32.
    B, S, H = 2, 8, 32
    eps = 1e-12

    key = jax.random.PRNGKey(0)
    k_x, k_r, k_w, k_b = jax.random.split(key, 4)

    hidden_states = jax.random.normal(k_x, (B, S, H), dtype=jnp.float32)
    input_tensor = jax.random.normal(k_r, (B, S, H), dtype=jnp.float32)

    # Deterministic synthetic parameters (PyTorch Linear layout: [out, in]).
    weight = jax.random.normal(k_w, (H, H), dtype=jnp.float32) * 0.02
    bias = jax.random.normal(k_b, (H,), dtype=jnp.float32) * 0.02
    gamma = jnp.ones((H,), dtype=jnp.float32)
    beta = jnp.zeros((H,), dtype=jnp.float32)

    out = albert_self_output(hidden_states, input_tensor, weight, bias,
                             gamma, beta, eps=eps)
    out = jax.block_until_ready(out)

    ref = _reference(hidden_states, input_tensor, weight, bias, gamma, beta, eps)
    assert out.shape == (B, S, H)
    assert jnp.allclose(out, ref, atol=1e-4, rtol=1e-4), "mismatch vs reference"

    print("KERNEL_OK")
</pallas_src>

<mosaic_0001>
module attributes {stable_mosaic.version = 11 : i64} {
  func.func @_self_output_kernel(%arg0: i32, %arg1: i32, %arg2: memref<16x32xf32, #tpu.memory_space<vmem>>, %arg3: memref<16x32xf32, #tpu.memory_space<vmem>>, %arg4: memref<32x32xf32, #tpu.memory_space<vmem>>, %arg5: memref<3x32xf32, #tpu.memory_space<vmem>>, %arg6: memref<16x32xf32, #tpu.memory_space<vmem>>, %arg7: memref<16x32xf32, #tpu.memory_space<vmem>>) attributes {dimension_semantics = [#tpu.dimension_semantics<parallel>, #tpu.dimension_semantics<arbitrary>], iteration_bounds = array<i64: 1, 1>, scalar_prefetch = 0 : i64, scratch_operands = 1 : i64, tpu.core_type = #tpu.core_type<tc>, window_params = [{transform_indices = @transform_0, window_bounds = array<i64: 16, 32>}, {transform_indices = @transform_1, window_bounds = array<i64: 16, 32>}, {transform_indices = @transform_2, window_bounds = array<i64: 32, 32>}, {pipeline_mode = #tpu.pipeline_mode<synchronous>, transform_indices = @transform_3, window_bounds = array<i64: 3, 32>}, {transform_indices = @transform_4, window_bounds = array<i64: 16, 32>}]} {
    %c0_i32 = arith.constant 0 : i32
    %0 = arith.cmpi eq, %arg1, %c0_i32 : i32
    %1 = arith.extui %0 : i1 to i32
    %c0_i32_0 = arith.constant 0 : i32
    %2 = arith.cmpi ne, %1, %c0_i32_0 : i32
    scf.if %2 {
      %cst_10 = arith.constant 0.000000e+00 : f32
      %12 = vector.broadcast %cst_10 : f32 to vector<16x32xf32>
      %c0_11 = arith.constant 0 : index
      %c0_12 = arith.constant 0 : index
      %13 = vector.load %arg7[%c0_11, %c0_12] : memref<16x32xf32, #tpu.memory_space<vmem>>, vector<16x32xf32>
      tpu.vector_store %arg7[%c0_11, %c0_12], %12 {strides = array<i32>} : memref<16x32xf32, #tpu.memory_space<vmem>>, vector<16x32xf32>,
    } else {
    }
    %c0 = arith.constant 0 : index
    %c0_1 = arith.constant 0 : index
    %3 = vector.load %arg7[%c0, %c0_1] : memref<16x32xf32, #tpu.memory_space<vmem>>, vector<16x32xf32>
    %c0_2 = arith.constant 0 : index
    %c0_3 = arith.constant 0 : index
    %4 = vector.load %arg2[%c0_2, %c0_3] : memref<16x32xf32, #tpu.memory_space<vmem>>, vector<16x32xf32>
    %c0_4 = arith.constant 0 : index
    %c0_5 = arith.constant 0 : index
    %5 = vector.load %arg4[%c0_4, %c0_5] : memref<32x32xf32, #tpu.memory_space<vmem>>, vector<32x32xf32>
    %cst = arith.constant dense<0.000000e+00> : vector<16x32xf32>
    %6 = tpu.matmul %4, %5, %cst {dimension_numbers = #tpu.dot_dimension_numbers<[1], [1], [0], [0], [0, 0, 1, 0], [], []>} : vector<16x32xf32>, vector<32x32xf32>, vector<16x32xf32> -> vector<16x32xf32>
    %7 = arith.addf %3, %6 : vector<16x32xf32>
    %c0_6 = arith.constant 0 : index
    %c0_7 = arith.constant 0 : index
    %8 = vector.load %arg7[%c0_6, %c0_7] : memref<16x32xf32, #tpu.memory_space<vmem>>, vector<16x32xf32>
    tpu.vector_store %arg7[%c0_6, %c0_7], %7 {strides = array<i32>} : memref<16x32xf32, #tpu.memory_space<vmem>>, vector<16x32xf32>,
    %c0_i32_8 = arith.constant 0 : i32
    %9 = arith.cmpi eq, %arg1, %c0_i32_8 : i32
    %10 = arith.extui %9 : i1 to i32
    %c0_i32_9 = arith.constant 0 : i32
    %11 = arith.cmpi ne, %10, %c0_i32_9 : i32
    scf.if %11 {
      %c0_10 = arith.constant 0 : index
      %c0_11 = arith.constant 0 : index
      %12 = vector.load %arg5[%c0_10, %c0_11] : memref<3x32xf32, #tpu.memory_space<vmem>>, vector<3x32xf32>
      %13 = vector.extract_strided_slice %12 {offsets = [0, 0], sizes = [1, 32], strides = [1, 1]} : vector<3x32xf32> to vector<1x32xf32>
      %14 = vector.extract_strided_slice %12 {offsets = [1, 0], sizes = [1, 32], strides = [1, 1]} : vector<3x32xf32> to vector<1x32xf32>
      %15 = vector.extract_strided_slice %12 {offsets = [2, 0], sizes = [1, 32], strides = [1, 1]} : vector<3x32xf32> to vector<1x32xf32>
      %c0_12 = arith.constant 0 : index
      %c0_13 = arith.constant 0 : index
      %16 = vector.load %arg7[%c0_12, %c0_13] : memref<16x32xf32, #tpu.memory_space<vmem>>, vector<16x32xf32>
      %17 = vector.broadcast %13 : vector<1x32xf32> to vector<16x32xf32>
      %18 = arith.addf %16, %17 : vector<16x32xf32>
      %c0_14 = arith.constant 0 : index
      %c0_15 = arith.constant 0 : index
      %19 = vector.load %arg3[%c0_14, %c0_15] : memref<16x32xf32, #tpu.memory_space<vmem>>, vector<16x32xf32>
      %20 = arith.addf %18, %19 : vector<16x32xf32>
      %cst_16 = arith.constant dense<0.000000e+00> : vector<16xf32>
      %21 = vector.multi_reduction <add>, %20, %cst_16 [1] : vector<16x32xf32> to vector<16xf32>
      %22 = vector.shape_cast %21 : vector<16xf32> to vector<16x1xf32>
      %cst_17 = arith.constant 3.200000e+01 : f32
      %23 = vector.broadcast %cst_17 : f32 to vector<16x1xf32>
      %24 = arith.divf %22, %23 : vector<16x1xf32>
      %25 = arith.mulf %20, %20 : vector<16x32xf32>
      %cst_18 = arith.constant dense<0.000000e+00> : vector<16xf32>
      %26 = vector.multi_reduction <add>, %25, %cst_18 [1] : vector<16x32xf32> to vector<16xf32>
      %27 = vector.shape_cast %26 : vector<16xf32> to vector<16x1xf32>
      %cst_19 = arith.constant 3.200000e+01 : f32
      %28 = vector.broadcast %cst_19 : f32 to vector<16x1xf32>
      %29 = arith.divf %27, %28 : vector<16x1xf32>
      %30 = arith.mulf %24, %24 : vector<16x1xf32>
      %31 = arith.subf %29, %30 : vector<16x1xf32>
      %cst_20 = arith.constant 0.000000e+00 : f32
      %32 = vector.broadcast %cst_20 : f32 to vector<16x1xf32>
      %33 = arith.maximumf %31, %32 : vector<16x1xf32>
      %34 = vector.broadcast %24 : vector<16x1xf32> to vector<16x32xf32>
      %35 = arith.subf %20, %34 : vector<16x32xf32>
      %cst_21 = arith.constant 9.99999996E-13 : f32
      %36 = vector.broadcast %cst_21 : f32 to vector<16x1xf32>
      %37 = arith.addf %33, %36 : vector<16x1xf32>
      %38 = math.rsqrt %37 : vector<16x1xf32>
      %39 = vector.broadcast %38 : vector<16x1xf32> to vector<16x32xf32>
      %40 = arith.mulf %35, %39 : vector<16x32xf32>
      %41 = vector.broadcast %14 : vector<1x32xf32> to vector<16x32xf32>
      %42 = arith.mulf %40, %41 : vector<16x32xf32>
      %43 = vector.broadcast %15 : vector<1x32xf32> to vector<16x32xf32>
      %44 = arith.addf %42, %43 : vector<16x32xf32>
      %c0_22 = arith.constant 0 : index
      %c0_23 = arith.constant 0 : index
      %45 = vector.load %arg6[%c0_22, %c0_23] : memref<16x32xf32, #tpu.memory_space<vmem>>, vector<16x32xf32>
      tpu.vector_store %arg6[%c0_22, %c0_23], %44 {strides = array<i32>} : memref<16x32xf32, #tpu.memory_space<vmem>>, vector<16x32xf32>,
    } else {
    }
    return
  }
  func.func @transform_0(%arg0: i32, %arg1: i32) -> (i32, i32) {
    %c0_i32 = arith.constant 0 : i32
    return %arg0, %arg1 : i32, i32
  }
  func.func @transform_1(%arg0: i32, %arg1: i32) -> (i32, i32) {
    %c0_i32 = arith.constant 0 : i32
    %c0_i32_0 = arith.constant 0 : i32
    return %arg0, %c0_i32 : i32, i32
  }
  func.func @transform_2(%arg0: i32, %arg1: i32) -> (i32, i32) {
    %c0_i32 = arith.constant 0 : i32
    %c0_i32_0 = arith.constant 0 : i32
    return %c0_i32, %arg1 : i32, i32
  }
  func.func @transform_3(%arg0: i32, %arg1: i32) -> (i32, i32) {
    %c0_i32 = arith.constant 0 : i32
    %c0_i32_0 = arith.constant 0 : i32
    %c0_i32_1 = arith.constant 0 : i32
    return %c0_i32, %c0_i32_0 : i32, i32
  }
  func.func @transform_4(%arg0: i32, %arg1: i32) -> (i32, i32) {
    %c0_i32 = arith.constant 0 : i32
    %c0_i32_0 = arith.constant 0 : i32
    return %arg0, %c0_i32 : i32, i32
  }
}

</mosaic_0001>

<bundles_post_ra>
// kernel: tpu_custom_call.1
= control target key start
LH: loop header
LB: loop body
LE: loop exit
PB: predicated region body
PF: predicated region fallthrough
CT: control target
= control target key end

     0   :  { %9 = vsyncpa [#allocation4], 0  ;;  %s484_s0 = inlined_call_operand.hbm [shape: f32[16,32], index: 0, kind: input, shape index: {}]   ;;  %s485_s1 = inlined_call_operand.hbm [shape: f32[16,32], index: 1, kind: input, shape index: {}]   ;;  %s486_s2 = inlined_call_operand.hbm [shape: f32[32,32], index: 2, kind: input, shape index: {}]   ;;  %s487_s3 = inlined_call_operand.hbm [shape: f32[3,32], index: 3, kind: input, shape index: {}]   ;;  %s488_s4 = inlined_call_operand.hbm [shape: f32[16,32], index: 4, kind: output, shape index: {}]  }
   0x1   :  { %10 = vsyncpa [#allocation7], 0 }
   0x2   :  { %11 = vsyncpa [#allocation10], 0 }
   0x3   :  { %12 = vsyncpa [#allocation5], 0  ;;  %s30_s17 = sshll.u32 %s485_s1, 4  ;;  %s392_s18 = smov [#allocation6]   ;;  %s31_s17 = int_to_ptr.hbm [resolvable:$true] %s30_s17 }
   0x4   :  { %s32_s19 = sshll.u32 %s392_s18, 4  ;;  %s17_s22 = sshll.u32 %s484_s0, 4  ;;  %s33_s19 = int_to_ptr.vmem [resolvable:$true] %s32_s19  ;;  %s18_s22 = int_to_ptr.hbm [resolvable:$true] %s17_s22 }
   0x5   :  { %s393_s23 = smov 128   ;;  %s394_s24 = smov 8  }
   0x6   :  { %38 = dma.hbm_to_vmem [thread:$0]  %s31_s17, 256, %s33_s19, [#allocation7], %s393_s23, %s393_s23, %s394_s24  }
   0x7   :  { %s395_s25 = smov [#allocation3]   ;;  %s43_s1 = sshll.u32 %s486_s2, 4  ;;  %s44_s1 = int_to_ptr.hbm [resolvable:$true] %s43_s1 }
   0x8   :  { %s19_s26 = sshll.u32 %s395_s25, 4  ;;  %s57_s30 = sshll.u32 %s487_s3, 4  ;;  %s20_s26 = int_to_ptr.vmem [resolvable:$true] %s19_s26  ;;  %s58_s30 = int_to_ptr.hbm [resolvable:$true] %s57_s30 }
   0x9   :  { %25 = dma.hbm_to_vmem [thread:$0]  %s18_s22, 256, %s20_s26, [#allocation4], %s393_s23, %s393_s23, %s394_s24  }
   0xa   :  { %s396_s5 = smov [#allocation8]   ;;  %s397_s7 = smov [#allocation9]  }
   0xb   :  { %s45_s6 = sshll.u32 %s396_s5, 4  ;;  %s59_s2 = sshll.u32 %s397_s7, 4  ;;  %s46_s6 = int_to_ptr.vmem [resolvable:$true] %s45_s6  ;;  %s60_s2 = int_to_ptr.vmem [resolvable:$true] %s59_s2 }
   0xc   :  { %51 = dma.hbm_to_vmem [thread:$0]  %s44_s1, 512, %s46_s6, [#allocation7], %s393_s23, %s393_s23, %s394_s24  }
   0xd   :  { %62 = dma.hbm_to_vmem [thread:$0]  %s58_s30, 64, %s60_s2, [#allocation10]  }
   0xe   :  { %384 = dma.done.wait [#allocation4], 256  }
   0xf   :  { %385 = vsyncadd [#allocation4], 4294967040 }
  0x10   :  { %386 = dma.done.wait [#allocation7], 768  }
  0x11   :  { %387 = vsyncadd [#allocation7], 4294966528 }
  0x12   :  { %388 = dma.done.wait [#allocation10], 64  }
  0x13   :  { %389 = vsyncadd [#allocation10], 4294967232  ;;  %vm83_vm0 = vcmask 261120   ;;  %v398_v0 = vmov 0.0   ;;  %v93_v1 = vld [vmem:[#allocation8 + $0x18] sm:$0xff]  ;;  %v92_v2 = vld [vmem:[#allocation8 + $0x10] sm:$0xff] }
  0x14   :  { %84 = vst.msk [vmem:[#allocation2] sm:$0xff] %vm83_vm0, %v398_v0  ;;  %239 = vmatpush.xpose.msk.msra.mxu0 %vm83_vm0, %v93_v1  ;;  %245 = vmatpush.xpose.msk.msra.mxu1 %vm83_vm0, %v93_v1  ;;  %v91_v3 = vld [vmem:[#allocation8 + $0x8] sm:$0xff]  ;;  %v90_v4 = vld [vmem:[#allocation8] sm:$0xff]  ;;  %v149_v16 = vld [vmem:[#allocation6] sm:$0xff]  ;;  %v399_v29 = vmov 32.0   ;;  %s400_s3 = smov [#allocation11]  }
  0x15   :  { %85 = vst.msk [vmem:[#allocation2 + $0x8] sm:$0xff] %vm83_vm0, %v398_v0  ;;  %v88_v5 = vld [vmem:[#allocation3] sm:$0xff]  ;;  %v89_v6 = vld [vmem:[#allocation3 + $0x8] sm:$0xff]  ;;  %v150_v20 = vld [vmem:[#allocation6 + $0x8] sm:$0xff]  ;;  %258 = vrcp.f32 %v399_v29  ;;  %s222_s8 = sshll.u32 %s400_s3, 4  ;;  %s224_s11 = sshll.u32 %s488_s4, 4  ;;  %s223_s8 = int_to_ptr.vmem [resolvable:$true] %s222_s8  ;;  %s225_s11 = int_to_ptr.hbm [resolvable:$true] %s224_s11 }
  0x16   :  { %v461_v13 = vld [vmem:[#allocation9] sm:$0x7] }
  0x17   :  { %v146_v14 = vperm.slane %v461_v13, 0  ;;  %v210_v59 = vperm.slane %v461_v13, 1  ;;  %v213_v1 = vperm.slane %v461_v13, 2 }
  0x18   :  { %240 = vmatpush.xpose.msk.msra.mxu0 %vm83_vm0, %v92_v2  ;;  %246 = vmatpush.xpose.msk.msra.mxu1 %vm83_vm0, %v92_v2 }
  0x1b   :  { %v86_v7 = vld [vmem:[#allocation2] sm:$0xff]  ;;  %v259_v30 = vpop.eup %258 }
  0x1c   :  { %241 = vmatpush.xpose.msk.msra.mxu0 %vm83_vm0, %v91_v3  ;;  %247 = vmatpush.xpose.msk.msra.mxu1 %vm83_vm0, %v91_v3  ;;  %v87_v8 = vld [vmem:[#allocation2 + $0x8] sm:$0xff]  ;;  %v160_v31 = vmul.f32 32.0, %v259_v30  ;;  %vm164_vm1 = vweird.f32 %v259_v30 }
  0x1e   :  { %v161_v32 = vsub.f32 1.0, %v160_v31 }
  0x20   :  { %242 = vmatpush.xpose.msk.msra.mxu0 %vm83_vm0, %v90_v4  ;;  %248 = vmatpush.xpose.msk.msra.mxu1 %vm83_vm0, %v90_v4  ;;  %v162_v33 = vmul.f32 %v259_v30, %v161_v32 }
  0x22   :  { %v163_v34 = vadd.f32 %v259_v30, %v162_v33 }
  0x23   :  { %243 = vmatmul.msk.f32.vlgmr.msra.gmra.mxu0 %vm83_vm0, %v88_v5  ;;  %244 = vmatmul.msk.f32.vlgmr.msra.gmra.mxu1 %vm83_vm0, %v89_v6 }
  0x24   :  { %v165_v35 = vsel %vm164_vm1, %v259_v30, %v163_v34 }
  0xa0   :  { %v130_v9 = vpop.f32.mrf.mxu0  ;;  %v133_v10 = vpop.f32.mrf.mxu1 }
  0xa1   :  { %v136_v11 = vadd.f32 %v130_v9, %v86_v7  ;;  %v137_v12 = vadd.f32 %v133_v10, %v87_v8 }
  0xa3   :  { %138 = vst.msk [vmem:[#allocation2] sm:$0xff] %vm83_vm0, %v136_v11 }
  0xa4   :  { %139 = vst.msk [vmem:[#allocation2 + $0x8] sm:$0xff] %vm83_vm0, %v137_v12 }
  0xaa   :  { %v144_v15 = vld [vmem:[#allocation2] sm:$0xff] }
  0xab   :  { %v147_v17 = vadd.f32 %v146_v14, %v144_v15  ;;  %v145_v18 = vld [vmem:[#allocation2 + $0x8] sm:$0xff] }
  0xac   :  { %v148_v19 = vadd.f32 %v146_v14, %v145_v18 }
  0xad   :  { %v151_v21 = vadd.f32 %v149_v16, %v147_v17 }
  0xae   :  { %v465_v24 = vadd.f32 %v150_v20, %v148_v19 }
  0xaf   :  { %v153_v22 = vsel %vm83_vm0, %v151_v21, 0.0  ;;  %v168_v23 = vmul.f32 %v151_v21, %v151_v21 }
  0xb0   :  { %154 = vadd.xlane.f32.xlu0 %v153_v22  ;;  %v169_v26 = vmul.f32 %v465_v24, %v465_v24  ;;  %v156_v27 = vsel %vm83_vm0, %v465_v24, 0.0 }
  0xb1   :  { %v170_v25 = vsel %vm83_vm0, %v168_v23, 0.0 }
  0xb2   :  { %171 = vadd.xlane.f32.xlu1 %v170_v25  ;;  %v173_v28 = vsel %vm83_vm0, %v169_v26, 0.0 }
  0xb8   :  { %157 = vadd.xlane.f32.xlu0 %v156_v27 }
  0xba   :  { %174 = vadd.xlane.f32.xlu1 %v173_v28 }
 0x123   :  { %v155_v36 = vpop.xlane.xlu0 %154 }
 0x124   :  { %v166_v37 = vmul.f32 %v165_v35, %v155_v36 }
 0x125   :  { %v172_v38 = vpop.xlane.xlu1 %171 }
 0x126   :  { %v178_v39 = vmul.f32 %v166_v37, %v166_v37  ;;  %v176_v40 = vmul.f32 %v172_v38, %v165_v35  ;;  %v184_v60 = vsub.f32 %v151_v21, %v166_v37 }
 0x128   :  { %v180_v41 = vsub.f32 %v176_v40, %v178_v39 }
 0x12a   :  { %v182_v42 = vmax.f32 %v180_v41, 0.0 }
 0x12b   :  { %v158_v43 = vpop.xlane.xlu0 %157 }
 0x12c   :  { %v186_v44 = vadd.f32 1e-12, %v182_v42  ;;  %v167_v45 = vmul.f32 %v165_v35, %v158_v43 }
 0x12d   :  { %v175_v46 = vpop.xlane.xlu1 %174 }
 0x12e   :  { %260 = vrsqrt.f32 %v186_v44  ;;  %v179_v47 = vmul.f32 %v167_v45, %v167_v45  ;;  %v177_v48 = vmul.f32 %v175_v46, %v165_v35  ;;  %vm194_vm3 = vweird.f32 %v186_v44 }
 0x12f   :  { %v185_v7 = vsub.f32 %v465_v24, %v167_v45 }
 0x130   :  { %v181_v49 = vsub.f32 %v177_v48, %v179_v47 }
 0x132   :  { %v183_v50 = vmax.f32 %v181_v49, 0.0 }
 0x134   :  { %v261_v51 = vpop.eup %260  ;;  %v187_v53 = vadd.f32 1e-12, %v183_v50 }
 0x135   :  { %v189_v52 = vmul.f32 %v261_v51, %v186_v44  ;;  %vm195_vm2 = vweird.f32 %v261_v51 }
 0x136   :  { %262 = vrsqrt.f32 %v187_v53  ;;  %vm196_vm4 = vmor %vm194_vm3, %vm195_vm2  ;;  %vm204_vm6 = vweird.f32 %v187_v53 }
 0x137   :  { %v190_v54 = vmul.f32 %v261_v51, %v189_v52 }
 0x139   :  { %v191_v55 = vmul.f32 0.5, %v190_v54 }
 0x13b   :  { %v192_v56 = vsub.f32 1.5, %v191_v55 }
 0x13c   :  { %v263_v57 = vpop.eup %262 }
 0x13d   :  { %v193_v58 = vmul.f32 %v261_v51, %v192_v56  ;;  %v199_v61 = vmul.f32 %v263_v57, %v187_v53  ;;  %vm205_vm5 = vweird.f32 %v263_v57 }
 0x13e   :  { %vm206_vm7 = vmor %vm204_vm6, %vm205_vm5 }
 0x13f   :  { %v197_v62 = vsel %vm196_vm4, %v261_v51, %v193_v58  ;;  %v200_v0 = vmul.f32 %v263_v57, %v199_v61 }
 0x140   :  { %v208_v63 = vmul.f32 %v197_v62, %v184_v60 }
 0x141   :  { %v201_v2 = vmul.f32 0.5, %v200_v0 }
 0x142   :  { %v211_v3 = vmul.f32 %v210_v59, %v208_v63 }
 0x143   :  { %v202_v4 = vsub.f32 1.5, %v201_v2 }
 0x144   :  { %v214_v5 = vadd.f32 %v213_v1, %v211_v3 }
 0x145   :  { %v203_v6 = vmul.f32 %v263_v57, %v202_v4 }
 0x146   :  { %216 = vst.msk [vmem:[#allocation11] sm:$0xff] %vm83_vm0, %v214_v5 }
 0x147   :  { %v207_v8 = vsel %vm206_vm7, %v263_v57, %v203_v6 }
 0x148   :  { %v209_v9 = vmul.f32 %v207_v8, %v185_v7 }
 0x14a   :  { %v212_v10 = vmul.f32 %v210_v59, %v209_v9 }
 0x14c   :  { %v215_v11 = vadd.f32 %v213_v1, %v212_v10 }
 0x14e   :  { %217 = vst.msk [vmem:[#allocation11 + $0x8] sm:$0xff] %vm83_vm0, %v215_v11 }
 0x14f   :  { %230 = dma.vmem_to_hbm [thread:$0]  %s223_s8, 256, %s225_s11, [#allocation5], %s393_s23, %s393_s23, %s394_s24  }
 0x150   :  { %390 = dma.done.wait [#allocation5], 256  }
 0x151   :  { %391 = vsyncadd [#allocation5], 4294967040 }
 0x152   :  { %235 = vsyncpa [#allocation4], 1 }
 0x153   :  { %236 = vsyncpa [#allocation7], 1 }
 0x154   :  { %237 = vsyncpa [#allocation10], 1 }
 0x155   :  { %238 = vsyncpa [#allocation5], 1 }

</bundles_post_ra>
